<compile_context>
chip_gen: v7x
topology: tpu7x:2x2x1
jax: 0.10.0
libtpu: 0.0.40
codegen_flags: <defaults>
</compile_context>

<pallas_src>
import jax
import jax.numpy as jnp
from jax.experimental import pallas as pl
from jax.experimental.pallas import tpu as pltpu


_SUBLANE = 8          # f32 sublane packing step (x is streamed as f32)
_LANE = 128
_ROW_CAP = 8192       # batch-tile row cap (was 1024)


def _round_up(x, m):
    return ((x + m - 1) // m) * m


def _cdiv(a, b):
    return -(-a // b)


# ---------------------------------------------------------------------------
# Kernel
# ---------------------------------------------------------------------------
def _discriminator_kernel(x_ref, w1_ref, b1_ref, w2_ref, b2_ref, o_ref):
    # Layer 1: cast the f32 x tile to the MXU dtype (bf16) in-kernel -> no extra
    # wrapper-side HBM pass over x.  f32 accumulation on the MXU.
    x = x_ref[...].astype(w1_ref.dtype)
    h = jnp.dot(x, w1_ref[...], preferred_element_type=jnp.float32)
    h = jnp.tanh(h + b1_ref[...])                        # (tile_b, H) f32, EUP tanh

    # Layer 2 (out_features == 1): contract the (1, H) w2 row with h over H.
    # Produces a lane-dense (1, tile_b) row directly (no N=1 column matmul, no
    # masked 1-lane store).  b2 is a scalar read from SMEM.
    logits = jax.lax.dot_general(
        w2_ref[...], h,
        dimension_numbers=(((1,), (1,)), ((), ())),
        preferred_element_type=jnp.float32)              # (1, tile_b)
    logits = logits + b2_ref[0, 0]
    o_ref[...] = jax.nn.sigmoid(logits).astype(o_ref.dtype)


# ---------------------------------------------------------------------------
# Tiling / VMEM heuristics
# ---------------------------------------------------------------------------
def _vmem_capacity_bytes():
    try:
        cap = int(pltpu.get_tpu_info().vmem_capacity_bytes)
        if cap > 0:
            return cap
    except Exception:
        pass
    return 64 * 1024 * 1024   # conservative default (v7x-class)


def _vmem_limits():
    cap = _vmem_capacity_bytes()
    if cap >= 96 * 1024 * 1024:
        # v5e / v6e: 128 MiB physical VMEM -> big tiles, explicit high limit.
        return 64 * 1024 * 1024, 96 * 1024 * 1024    # (picker budget, vmem_limit)
    # v7x-class 64 MiB parts: keep a conservative per-core footprint so the
    # megacore-replicated resident weights + pipeline buffers stay well inside.
    return 24 * 1024 * 1024, 32 * 1024 * 1024


def _tile_footprint_bytes(t, n_inputs, hidden):
    n_pad = _round_up(n_inputs, _LANE)
    h_pad = _round_up(hidden, _LANE)
    x_buf = 3 * t * n_pad * 4                 # f32 x stream, up to triple-buffered
    x_cast = t * n_pad * 2                    # in-kernel bf16 copy of the x tile
    h_buf = t * h_pad * 4                     # f32 hidden activations
    o_buf = 2 * _round_up(t, _LANE) * 4       # (1, t) output row, double-buffered
    w_buf = 2 * (n_inputs * h_pad * 2 + 2 * h_pad * 4)   # resident w1/b1/w2
    return x_buf + x_cast + h_buf + o_buf + w_buf


def _pick_grid(B, n_inputs, hidden, vmem_budget_bytes):
    """Returns (tile_b, num_tiles, B_pad)."""
    step = _SUBLANE
    if B <= step:
        return B, 1, B
    B8 = _round_up(B, step)

    # Largest sublane-aligned tile under the row cap and the VMEM budget.
    max_t = (min(B8, _ROW_CAP) // step) * step
    while max_t > step and _tile_footprint_bytes(max_t, n_inputs, hidden) > vmem_budget_bytes:
        max_t -= step

    num_tiles = _cdiv(B8, max_t)
    # Keep both v7x TensorCores busy for moderately large batches.
    if num_tiles == 1 and B8 >= 256:
        num_tiles = 2
    # Even step count -> balanced split across the two cores.
    if num_tiles > 1 and num_tiles % 2 == 1:
        num_tiles += 1

    tile_b = _round_up(_cdiv(B8, num_tiles), step)
    return tile_b, num_tiles, num_tiles * tile_b


# ---------------------------------------------------------------------------
# Wrapper
# ---------------------------------------------------------------------------
def discriminator_forward(x, w1, b1, w2, b2, *, tile_b=None, use_bf16_compute=True):
    """x: [B, n_inputs]; w1: [n_inputs, H]; b1: [H]-like; w2: [H, 1]-like; b2: scalar-like."""
    B, n_inputs = x.shape
    H = w1.shape[1]
    out_dtype = x.dtype

    # Parameter plumbing (wrapper-side layout only; tiny resident tensors).
    b1 = jnp.asarray(b1, jnp.float32).reshape(1, H)
    w2_row = jnp.asarray(w2, jnp.float32).reshape(1, H)
    b2 = jnp.asarray(b2, jnp.float32).reshape(1, 1)
    w1 = w1.astype(jnp.bfloat16 if use_bf16_compute else jnp.float32)
    # x stays f32 in HBM; the bf16 cast happens in-kernel (single HBM pass over x).
    x = x.astype(jnp.float32)

    pick_budget, vmem_limit = _vmem_limits()

    if tile_b is None:
        tile_b, num_tiles, B_pad = _pick_grid(B, n_inputs, H, pick_budget)
    else:
        if tile_b <= 0:
            raise ValueError(f"tile_b={tile_b} must be positive")
        if tile_b != B and tile_b % _SUBLANE != 0:
            raise ValueError(f"tile_b={tile_b} must be a multiple of {_SUBLANE} (or equal B)")
        num_tiles = _cdiv(B, tile_b)
        B_pad = num_tiles * tile_b

    # Ragged batch: pad up to a tile multiple (kept multi-step & pipelined),
    # slice the tail off after the kernel.
    if B_pad != B:
        x = jnp.pad(x, ((0, B_pad - B), (0, 0)))

    # Deeper buffering on the only streamed input when the grid is long enough.
    if num_tiles >= 3:
        x_spec = pl.BlockSpec((tile_b, n_inputs), lambda i: (i, 0),
                              pipeline_mode=pl.Buffered(3))
    else:
        x_spec = pl.BlockSpec((tile_b, n_inputs), lambda i: (i, 0))

    w1_bytes = n_inputs * H * jnp.dtype(w1.dtype).itemsize
    cost = pl.CostEstimate(
        flops=2 * B_pad * n_inputs * H + 2 * B_pad * H,
        transcendentals=B_pad * H + B_pad,
        bytes_accessed=(B_pad * n_inputs * 4                 # x (f32, single pass)
                        + w1_bytes                            # w1 (resident)
                        + 2 * H * 4 + 4                       # b1, w2, b2
                        + B_pad * jnp.dtype(out_dtype).itemsize))

    out_2d = pl.pallas_call(
        _discriminator_kernel,
        out_shape=jax.ShapeDtypeStruct((num_tiles, tile_b), out_dtype),
        grid_spec=pltpu.PrefetchScalarGridSpec(
            num_scalar_prefetch=0,
            grid=(num_tiles,),
            in_specs=[
                x_spec,                                               # x tile (streamed)
                pl.BlockSpec((n_inputs, H), lambda i: (0, 0)),        # w1 (resident)
                pl.BlockSpec((1, H), lambda i: (0, 0)),               # b1
                pl.BlockSpec((1, H), lambda i: (0, 0)),               # w2 row
                pl.BlockSpec(memory_space=pltpu.MemorySpace.SMEM),    # b2 scalar
            ],
            # Lane-dense output row per grid step -> unmasked wide stores.
            out_specs=pl.BlockSpec((1, tile_b), lambda i: (i, 0)),
        ),
        compiler_params=pltpu.CompilerParams(
            dimension_semantics=("parallel",),    # megacore-shardable on v7x
            vmem_limit_bytes=vmem_limit,
        ),
        cost_estimate=cost,
    )(x, w1, b1, w2_row, b2)

    out = out_2d.reshape(B_pad, 1)
    if B_pad != B:
        out = out[:B]
    return out


# ---------------------------------------------------------------------------
# Reference (matches the in-kernel bf16 MXU / f32-accumulation numerics)
# ---------------------------------------------------------------------------
def _reference_forward(x, w1, b1, w2, b2, *, use_bf16_compute=True):
    cdt = jnp.bfloat16 if use_bf16_compute else jnp.float32
    h = jnp.tanh(jnp.dot(x.astype(cdt), w1.astype(cdt),
                         preferred_element_type=jnp.float32)
                 + jnp.asarray(b1, jnp.float32).reshape(1, -1))
    logits = jnp.dot(h, jnp.asarray(w2, jnp.float32).reshape(-1, 1),
                     preferred_element_type=jnp.float32)
    logits = logits + jnp.asarray(b2, jnp.float32).reshape(1, 1)
    return jax.nn.sigmoid(logits)


if __name__ == "__main__":
    # Shapes consistent with the module: n_inputs=32, hidden=64.
    N_IN, HID = 32, 64

    key = jax.random.PRNGKey(0)
    kx, k1, kb1, k2, kb2, kx2, kx3 = jax.random.split(key, 7)

    # Deterministic parameter init (PyTorch Linear-style uniform bounds).
    bound1 = 1.0 / (N_IN ** 0.5)
    bound2 = 1.0 / (HID ** 0.5)
    w1 = jax.random.uniform(k1, (N_IN, HID), minval=-bound1, maxval=bound1, dtype=jnp.float32)
    b1 = jax.random.uniform(kb1, (1, HID), minval=-bound1, maxval=bound1, dtype=jnp.float32)
    w2 = jax.random.uniform(k2, (HID, 1), minval=-bound2, maxval=bound2, dtype=jnp.float32)
    b2 = jax.random.uniform(kb2, (1, 1), minval=-bound2, maxval=bound2, dtype=jnp.float32)

    # 1) Small batch (single tile).
    B = 8
    x = jax.random.normal(kx, (B, N_IN), dtype=jnp.float32)
    out = jax.block_until_ready(discriminator_forward(x, w1, b1, w2, b2))
    ref = _reference_forward(x, w1, b1, w2, b2)
    assert out.shape == (B, 1)
    assert jnp.allclose(out, ref, atol=2e-4, rtol=2e-4)

    # 2) Multi-tile grid exercising the Buffered(3) x stream (explicit tile_b).
    B2 = 256
    x2 = jax.random.normal(kx2, (B2, N_IN), dtype=jnp.float32)
    out2 = jax.block_until_ready(discriminator_forward(x2, w1, b1, w2, b2, tile_b=64))
    ref2 = _reference_forward(x2, w1, b1, w2, b2)
    assert out2.shape == (B2, 1)
    assert jnp.allclose(out2, ref2, atol=2e-4, rtol=2e-4)

    # 3) Ragged batch exercising the pad-and-slice path.
    B3 = 10
    x3 = jax.random.normal(kx3, (B3, N_IN), dtype=jnp.float32)
    out3 = jax.block_until_ready(discriminator_forward(x3, w1, b1, w2, b2))
    ref3 = _reference_forward(x3, w1, b1, w2, b2)
    assert out3.shape == (B3, 1)
    assert jnp.allclose(out3, ref3, atol=2e-4, rtol=2e-4)

    print("KERNEL_OK")
</pallas_src>

<mosaic_0001>
module attributes {stable_mosaic.version = 11 : i64} {
  func.func @_discriminator_kernel(%arg0: i32, %arg1: memref<8x32xf32, #tpu.memory_space<vmem>>, %arg2: memref<32x64xbf16, #tpu.memory_space<vmem>>, %arg3: memref<1x64xf32, #tpu.memory_space<vmem>>, %arg4: memref<1x64xf32, #tpu.memory_space<vmem>>, %arg5: memref<1x1xf32, #tpu.memory_space<smem>>, %arg6: memref<1x8xf32, #tpu.memory_space<vmem>>) attributes {dimension_semantics = [#tpu.dimension_semantics<parallel>], iteration_bounds = array<i64: 1>, scalar_prefetch = 0 : i64, scratch_operands = 0 : i64, tpu.core_type = #tpu.core_type<tc>, window_params = [{transform_indices = @transform_0, window_bounds = array<i64: 8, 32>}, {pipeline_mode = #tpu.pipeline_mode<synchronous>, transform_indices = @transform_1, window_bounds = array<i64: 32, 64>}, {pipeline_mode = #tpu.pipeline_mode<synchronous>, transform_indices = @transform_2, window_bounds = array<i64: 1, 64>}, {pipeline_mode = #tpu.pipeline_mode<synchronous>, transform_indices = @transform_3, window_bounds = array<i64: 1, 64>}, {transform_indices = @transform_4, window_bounds = array<i64: 1, 1>}, {transform_indices = @transform_5, window_bounds = array<i64: 1, 8>}]} {
    %c0 = arith.constant 0 : index
    %c0_0 = arith.constant 0 : index
    %0 = vector.load %arg1[%c0, %c0_0] : memref<8x32xf32, #tpu.memory_space<vmem>>, vector<8x32xf32>
    %1 = arith.truncf %0 : vector<8x32xf32> to vector<8x32xbf16>
    %c0_1 = arith.constant 0 : index
    %c0_2 = arith.constant 0 : index
    %2 = vector.load %arg2[%c0_1, %c0_2] : memref<32x64xbf16, #tpu.memory_space<vmem>>, vector<32x64xbf16>
    %cst = arith.constant dense<0.000000e+00> : vector<8x64xf32>
    %3 = tpu.matmul %1, %2, %cst {dimension_numbers = #tpu.dot_dimension_numbers<[1], [0], [0], [1], [0, 0, 1, 1], [], []>} : vector<8x32xbf16>, vector<32x64xbf16>, vector<8x64xf32> -> vector<8x64xf32>
    %c0_3 = arith.constant 0 : index
    %c0_4 = arith.constant 0 : index
    %4 = vector.load %arg3[%c0_3, %c0_4] : memref<1x64xf32, #tpu.memory_space<vmem>>, vector<1x64xf32>
    %5 = vector.broadcast %4 : vector<1x64xf32> to vector<8x64xf32>
    %6 = arith.addf %3, %5 : vector<8x64xf32>
    %7 = math.tanh %6 : vector<8x64xf32>
    %c0_5 = arith.constant 0 : index
    %c0_6 = arith.constant 0 : index
    %8 = vector.load %arg4[%c0_5, %c0_6] : memref<1x64xf32, #tpu.memory_space<vmem>>, vector<1x64xf32>
    %cst_7 = arith.constant dense<0.000000e+00> : vector<1x8xf32>
    %9 = tpu.matmul %8, %7, %cst_7 {dimension_numbers = #tpu.dot_dimension_numbers<[1], [1], [0], [0], [0, 0, 1, 0], [], []>} : vector<1x64xf32>, vector<8x64xf32>, vector<1x8xf32> -> vector<1x8xf32>
    %c0_8 = arith.constant 0 : index
    %c0_9 = arith.constant 0 : index
    %10 = memref.load %arg5[%c0_8, %c0_9] : memref<1x1xf32, #tpu.memory_space<smem>>
    %11 = vector.broadcast %10 : f32 to vector<1x8xf32>
    %12 = arith.addf %9, %11 : vector<1x8xf32>
    %13 = arith.negf %12 : vector<1x8xf32>
    %14 = math.exp %13 : vector<1x8xf32>
    %cst_10 = arith.constant 1.000000e+00 : f32
    %15 = vector.broadcast %cst_10 : f32 to vector<1x8xf32>
    %16 = arith.addf %15, %14 : vector<1x8xf32>
    %17 = arith.divf %15, %16 : vector<1x8xf32>
    %c0_11 = arith.constant 0 : index
    %c0_12 = arith.constant 0 : index
    %18 = vector.load %arg6[%c0_11, %c0_12] : memref<1x8xf32, #tpu.memory_space<vmem>>, vector<1x8xf32>
    tpu.vector_store %arg6[%c0_11, %c0_12], %17 {strides = array<i32>} : memref<1x8xf32, #tpu.memory_space<vmem>>, vector<1x8xf32>,
    return
  }
  func.func @transform_0(%arg0: i32) -> (i32, i32) {
    %c0_i32 = arith.constant 0 : i32
    %c0_i32_0 = arith.constant 0 : i32
    return %arg0, %c0_i32 : i32, i32
  }
  func.func @transform_1(%arg0: i32) -> (i32, i32) {
    %c0_i32 = arith.constant 0 : i32
    %c0_i32_0 = arith.constant 0 : i32
    %c0_i32_1 = arith.constant 0 : i32
    return %c0_i32, %c0_i32_0 : i32, i32
  }
  func.func @transform_2(%arg0: i32) -> (i32, i32) {
    %c0_i32 = arith.constant 0 : i32
    %c0_i32_0 = arith.constant 0 : i32
    %c0_i32_1 = arith.constant 0 : i32
    return %c0_i32, %c0_i32_0 : i32, i32
  }
  func.func @transform_3(%arg0: i32) -> (i32, i32) {
    %c0_i32 = arith.constant 0 : i32
    %c0_i32_0 = arith.constant 0 : i32
    %c0_i32_1 = arith.constant 0 : i32
    return %c0_i32, %c0_i32_0 : i32, i32
  }
  func.func @transform_4(%arg0: i32) -> (i32, i32) {
    %c0_i32 = arith.constant 0 : i32
    %c0_i32_0 = arith.constant 0 : i32
    %c0_i32_1 = arith.constant 0 : i32
    return %c0_i32, %c0_i32_0 : i32, i32
  }
  func.func @transform_5(%arg0: i32) -> (i32, i32) {
    %c0_i32 = arith.constant 0 : i32
    %c0_i32_0 = arith.constant 0 : i32
    return %arg0, %c0_i32 : i32, i32
  }
}

</mosaic_0001>

<bundles_post_ra>
// kernel: tpu_custom_call.1
= control target key start
LH: loop header
LB: loop body
LE: loop exit
PB: predicated region body
PF: predicated region fallthrough
CT: control target
= control target key end

     0   :  { %11 = vsyncpa [#allocation4], 0  ;;  %s424_s0 = inlined_call_operand.hbm [shape: f32[8,32], index: 0, kind: input, shape index: {}]   ;;  %s425_s1 = inlined_call_operand.hbm [shape: bf16[32,64], index: 1, kind: input, shape index: {}]   ;;  %s426_s2 = inlined_call_operand.vmem [shape: f32[1,64], index: 2, kind: input, shape index: {}]   ;;  %s427_s3 = inlined_call_operand.vmem [shape: f32[1,64], index: 3, kind: input, shape index: {}]   ;;  %s428_s4 = inlined_call_operand.<no memory space> [shape: f32[1,1], index: 4, kind: input, shape index: {}]   ;;  %s429_s5 = inlined_call_operand.hbm [shape: f32[1,8], index: 5, kind: output, shape index: {}]  }
   0x1   :  { %12 = vsyncpa [#allocation7], 0 }
   0x2   :  { %13 = vsyncpa [#allocation5], 0  ;;  %s335_s18 = smov [#allocation3]   ;;  %s336_s20 = smov [#allocation6]  }
   0x3   :  { %s20_s19 = sshll.u32 %s335_s18, 4  ;;  %s29_s21 = sshll.u32 %s336_s20, 4  ;;  %s21_s19 = int_to_ptr.vmem [resolvable:$true] %s20_s19  ;;  %s372_s21 = int_to_ptr.vmem [resolvable:$true] %s29_s21 }
   0x4   :  { %s263_s24 = scalar_lea.hbm %s424_s0, 128 }
   0x5   :  { %p264_p0 = scmp.ne.s32.totalorder %s424_s0, %s263_s24  ;;  %p267_p1 = scmp.lt.u32.totalorder %s263_s24, %s424_s0 }
   0x7   :  { %p269_p2 = pnand %p267_p1, %p264_p0 }
   0x9   :  { %272 = shalt.err (!%p269_p2)
}
   0xa   :  { %s273_s29 = scalar_lea.vmem %s21_s19, 128  ;;  %p278_p4 = scmp.lt.s32.totalorder %s21_s19, %s21_s19 }
   0xb   :  { %p274_p3 = scmp.ne.s32.totalorder %s21_s19, %s273_s29  ;;  %p279_p5 = scmp.lt.s32.totalorder %s273_s29, %s273_s29 }
   0xd   :  { %p280_p6 = por %p279_p5, %p278_p4 }
   0xf   :  { %p281_p7 = pnand %p280_p6, %p274_p3 }
  0x11   :  { %284 = shalt.err (!%p281_p7)
}
  0x12   :  { %23 = dma.hbm_to_vmem [thread:$0]  %s424_s0, 128, %s21_s19, [#allocation4]  }
  0x13   :  { %s285_s9 = scalar_lea.hbm %s425_s1, 256 }
  0x14   :  { %p286_p8 = scmp.ne.s32.totalorder %s425_s1, %s285_s9  ;;  %p289_p9 = scmp.lt.u32.totalorder %s285_s9, %s425_s1 }
  0x16   :  { %p291_p10 = pnand %p289_p9, %p286_p8 }
  0x18   :  { %294 = shalt.err (!%p291_p10)
}
  0x19   :  { %s295_s14 = scalar_lea.vmem %s372_s21, 256  ;;  %p300_p12 = scmp.lt.s32.totalorder %s372_s21, %s372_s21 }
  0x1a   :  { %p296_p11 = scmp.ne.s32.totalorder %s372_s21, %s295_s14  ;;  %p301_p13 = scmp.lt.s32.totalorder %s295_s14, %s295_s14 }
  0x1c   :  { %p302_p0 = por %p301_p13, %p300_p12 }
  0x1e   :  { %p303_p1 = pnand %p302_p0, %p296_p11 }
  0x20   :  { %306 = shalt.err (!%p303_p1)
}
  0x21   :  { %s337_s0 = smov 64   ;;  %s338_s15 = smov 4  }
  0x22   :  { %35 = dma.hbm_to_vmem [thread:$0]  %s425_s1, 256, %s372_s21, [#allocation7], %s337_s0, %s337_s0, %s338_s15  }
  0x23   :  { %329 = dma.done.wait [#allocation4], 128  }
  0x24   :  { %330 = vsyncadd [#allocation4], 4294967168 }
  0x25   :  { %331 = dma.done.wait [#allocation7], 256  }
  0x26   :  { %332 = vsyncadd [#allocation7], 4294967040  ;;  %v339_v0 = vmov 0.0   ;;  %vm340_vm0 = vmmov 0   ;;  %v255_v1 = vld [vmem:[#allocation6] sm:$0xff]   ;;  %v256_v2 = vld [vmem:[#allocation6 + $0x8] sm:$0xff]   ;;  %v121_v13 = vstv %s428_s4 }
  0x27   :  { %235 = vmatprep.subr.bf16.mxu0 %v339_v0  ;;  %239 = vmatprep.mubr.msk.bf16.mxu0 %vm340_vm0, %v339_v0  ;;  %v49_v3 = vld [vmem:[#allocation3] sm:$0xff]  ;;  %vm74_vm1 = vcmask 261120   ;;  %vm122_vm2 = vcmask 523264   ;;  %vm205_vm3 = vcmask 57344  }
  0x28   :  { %243 = vmatprep.subr.mxu1 %v339_v0  ;;  %245 = vmatprep.mubr.msk.f32.mxu1 %vm340_vm0, %v339_v0  ;;  %v50_v4 = vpack.c.bf16 %v49_v3, %v49_v3  ;;  %v223_v5 = vld [vmem:[%s426_s2] ss:$0 sm:$0xff]  ;;  %s341_s2 = smov [#allocation8]  }
  0x29   :  { %236 = vmatpush3.bf16.msra.mxu0 %v255_v1  ;;  %v119_v12 = vld [vmem:[%s427_s3] sm:$0x1]  ;;  %s213_s23 = sshll.u32 %s341_s2, 4  ;;  %s214_s23 = int_to_ptr.vmem [resolvable:$true] %s213_s23 }
  0x2a   :  { %237 = vmatprep.subr.bf16.mxu0 %v339_v0  ;;  %s307_s3 = scalar_lea.vmem %s214_s23, 16  ;;  %s311_s24 = scalar_lea.vmem %s214_s23, 32 }
  0x2b   :  { %p308_p2 = scmp.ne.s32.totalorder %s214_s23, %s307_s3  ;;  %p312_p3 = scmp.lt.s32.totalorder %s214_s23, %s214_s23 }
  0x2c   :  { %p313_p4 = scmp.lt.s32.totalorder %s311_s24, %s307_s3 }
  0x2d   :  { %238 = vmatpush3.bf16.msra.mxu0 %v256_v2 }
  0x2e   :  { %p314_p5 = por %p313_p4, %p312_p3 }
  0x30   :  { %240 = vmatmul.mubr.msk.bf16.vlgmr.msra.gmra.mrb[0].mxu0 %vm74_vm1, %v50_v4  ;;  %p315_p6 = pnand %p314_p5, %p308_p2 }
 0x103   :  { %v112_v6 = vpop.f32.mrb[0].mxu0 }
 0x104   :  { %v113_v7 = vadd.f32 %v223_v5, %v112_v6  ;;  %v241_v8 = vpop.f32.mrb[1].mxu0 }
 0x105   :  { %v115_v9 = vpop.f32.mrb[2].mxu0 }
 0x106   :  { %257 = vtanh.f32 %v113_v7  ;;  %v242_v10 = vpop.f32.mrb[3].mxu0 }
 0x110   :  { %v258_v11 = vpop.eup %257 }
 0x111   :  { %244 = vmatpush3.xpose.msk.msra.mxu1 %vm122_vm2, %v258_v11 }
 0x114   :  { %246 = vmatmul.mubr.msk.f32.vlgmr.msra.gmra.mrb[0].mxu1 %vm122_vm2, %v119_v12 }
 0x1e7   :  { %v195_v14 = vpop.f32.mrb[0].mxu1 }
 0x1e8   :  { %v196_v15 = vadd.f32 %v195_v14, %v121_v13  ;;  %v247_v16 = vpop.f32.mrb[1].mxu1 }
 0x1ea   :  { %v229_v17 = vmul.f32 -1.442695, %v196_v15 }
 0x1ec   :  { %259 = vpow2.f32 %v229_v17 }
 0x1f6   :  { %v260_v18 = vpop.eup %259 }
 0x1f7   :  { %v202_v19 = vadd.f32 1.0, %v260_v18 }
 0x1f9   :  { %261 = vrcp.f32 %v202_v19 }
 0x203   :  { %v262_v20 = vpop.eup %261 }
 0x204   :  { %206 = vst.msk [vmem:[#allocation8] sm:$0x1] %vm205_vm3, %v262_v20 }
 0x205   :  { %318 = shalt.err (!%p315_p6)
}
 0x206   :  { %s319_s26 = scalar_lea.hbm %s429_s5, 16 }
 0x207   :  { %p320_p7 = scmp.ne.s32.totalorder %s429_s5, %s319_s26  ;;  %p323_p8 = scmp.lt.u32.totalorder %s319_s26, %s429_s5 }
 0x209   :  { %p325_p9 = pnand %p323_p8, %p320_p7 }
 0x20b   :  { %328 = shalt.err (!%p325_p9)
}
 0x20c   :  { %216 = dma.vmem_to_hbm [thread:$0]  %s214_s23, 16, %s429_s5, [#allocation5]  }
 0x20d   :  { %333 = dma.done.wait [#allocation5], 16  }
 0x20e   :  { %334 = vsyncadd [#allocation5], 4294967280 }
 0x20f   :  { %220 = vsyncpa [#allocation4], 1 }
 0x210   :  { %221 = vsyncpa [#allocation7], 1 }
 0x211   :  { %222 = vsyncpa [#allocation5], 1 }

</bundles_post_ra>
